<compile_context>
chip_gen: v7x
topology: tpu7x:2x2x1
jax: 0.10.0
libtpu: 0.0.40
codegen_flags: <defaults>
</compile_context>

<pallas_src>
import jax
import jax.numpy as jnp
import numpy as np
from jax import lax
from jax.experimental import pallas as pl
from jax.experimental.pallas import tpu as pltpu


def make_dense_layer_kernel(B_blk, H, W, C_in, C_mid, C_out):
    WC_in = W * C_in
    WC_mid = W * C_mid
    WC_out = W * C_out
    M = B_blk * H

    def kernel(x_ref, s1_ref, b1_ref, w1_ref, b2_ref, w2_ref, o_ref):
        # Block shapes:
        #   x_ref : (B_blk, H, W*C_in)          lane order = (w, c_in)
        #   s1/b1 : (1, W*C_in)                 BN1 scale/shift tiled across W
        #   w1    : (W*C_in, W*C_mid) bf16      block-diag 1x1 weight * BN2 scale
        #   b2    : (1, W*C_mid)                BN2 shift tiled across W
        #   w2    : (3, W*C_mid, W*C_out) bf16  per-ky shifted-block-diag weights
        #   o_ref : (B_blk, H, W*C_out)         lane-dense output

        # Fold the B_blk images into one (M, lanes) slab.  H % 8 == 0, so this
        # reshape is layout-preserving (pure sublane-group stacking).
        x = x_ref[...].reshape(M, WC_in)

        # --- norm1 (eval) + relu1 : f32 VPU math, lane-dense -----------------
        xn = jnp.maximum(x * s1_ref[...] + b1_ref[...], 0.0)        # (M, WC_in)

        # --- conv1 (1x1) with BN2 scale folded into the weight: one matmul ---
        h = jnp.dot(xn.astype(jnp.bfloat16), w1_ref[...],
                    preferred_element_type=jnp.float32)             # (M, WC_mid)

        # --- norm2 shift (scale already folded) + relu2 ----------------------
        h = jnp.maximum(h + b2_ref[...], 0.0)

        # --- H-direction zero padding: in-register rolls + per-image masks ---
        # Slab row r is image row (r % H).  The ky=0 tap needs h[r-1] (zero at
        # the first row of each image); ky=2 needs h[r+1] (zero at the last
        # row).  Rolls land on the XLU slot; masks are cheap VPU muls.
        row = lax.broadcasted_iota(jnp.int32, (M, 1), 0)
        r_img = row % H
        keep_top = (r_img != 0).astype(jnp.float32)       # zero 1st row / image
        keep_bot = (r_img != H - 1).astype(jnp.float32)   # zero last row / image

        h_up = pltpu.roll(h, 1, 0) * keep_top       # h[r-1] with zero padding
        h_dn = pltpu.roll(h, M - 1, 0) * keep_bot   # h[r+1] with zero padding

        # --- conv2 (3x3, pad=1): 3 matmuls, K = W*C_mid ----------------------
        # kx shift + W-direction zero padding are folded into w2_ref[ky].
        acc = jnp.dot(h_up.astype(jnp.bfloat16), w2_ref[0],
                      preferred_element_type=jnp.float32)           # (M, WC_out)
        acc = acc + jnp.dot(h.astype(jnp.bfloat16), w2_ref[1],
                            preferred_element_type=jnp.float32)
        acc = acc + jnp.dot(h_dn.astype(jnp.bfloat16), w2_ref[2],
                            preferred_element_type=jnp.float32)

        o_ref[...] = acc.reshape(B_blk, H, WC_out).astype(o_ref.dtype)

    return kernel


def _choose_batch_block(N, H, target_rows=256):
    """Images per grid step: aim for M = B_blk*H ~ target_rows of MXU rows,
    while keeping >= 2 grid steps when N allows it (v7x has 2 TensorCores)."""
    if N <= 1:
        return max(N, 1)
    b = max(1, min(N // 2, max(1, target_rows // H)))
    while N % b:      # keep the grid exact
        b -= 1
    return b


def dense_layer_forward(x_nchw, params, eps=1e-5, batch_block=None):
    """Pallas implementation of _DenseLayer.forward (eval mode, drop_rate=0)."""
    g1, be1, m1, v1, w1, g2, be2, m2, v2, w2 = params
    N, C_in, H, W = x_nchw.shape
    C_mid = w1.shape[0]          # bn_size * growth_rate
    C_out = w2.shape[0]          # growth_rate
    WC_in, WC_mid, WC_out = W * C_in, W * C_mid, W * C_out

    B_blk = batch_block if batch_block is not None else _choose_batch_block(N, H)
    assert N % B_blk == 0

    # NCHW -> (N, H, W*C_in), lane order (w, c_in)  (wrapper-side XLA reshape)
    x = jnp.transpose(x_nchw, (0, 2, 3, 1)).reshape(N, H, WC_in).astype(jnp.float32)

    # fold BN1 (eval) into per-channel scale/shift, tiled across W to match lanes
    inv1 = g1 / jnp.sqrt(v1 + eps)
    s1 = jnp.tile(inv1, W).reshape(1, WC_in)
    b1 = jnp.tile(be1 - m1 * inv1, W).reshape(1, WC_in)

    # BN2 (eval): fold the multiplicative part into conv1's output channels
    # (conv1 is linear; ReLU comes after BN2), keep only the additive shift.
    inv2 = g2 / jnp.sqrt(v2 + eps)
    b2 = jnp.tile(be2 - m2 * inv2, W).reshape(1, WC_mid)

    # conv1 (1x1): block-diagonal matmul weight over the W positions,
    # columns pre-scaled by the BN2 scale.
    w1m = w1.reshape(C_mid, C_in).T.astype(jnp.float32) * inv2[None, :]  # (C_in, C_mid)
    eye_w = jnp.eye(W, dtype=jnp.float32)
    w1_big = jnp.kron(eye_w, w1m).astype(jnp.bfloat16)           # (W*C_in, W*C_mid)

    # conv2 (3x3, pad=1): one shifted-block-diagonal weight per ky tap.
    # Block (x_in, x_out) is non-zero iff x_in == x_out + kx - 1, which also
    # implements the W-direction zero padding at the edges.
    w2_f = w2.astype(jnp.float32)
    w2_rows = []
    for ky in range(3):
        acc = jnp.zeros((WC_mid, WC_out), jnp.float32)
        for kx in range(3):
            shift = jnp.eye(W, W, 1 - kx, dtype=jnp.float32)     # (W, W)
            tap = w2_f[:, :, ky, kx].T                           # (C_mid, C_out)
            acc = acc + jnp.kron(shift, tap)
        w2_rows.append(acc)
    w2_big = jnp.stack(w2_rows, axis=0).astype(jnp.bfloat16)     # (3, W*C_mid, W*C_out)

    kernel = make_dense_layer_kernel(B_blk, H, W, C_in, C_mid, C_out)

    out = pl.pallas_call(
        kernel,
        out_shape=jax.ShapeDtypeStruct((N, H, WC_out), jnp.float32),
        grid_spec=pltpu.PrefetchScalarGridSpec(
            num_scalar_prefetch=0,
            grid=(N // B_blk,),
            in_specs=[
                pl.BlockSpec((B_blk, H, WC_in), lambda n: (n, 0, 0)),
                pl.BlockSpec((1, WC_in), lambda n: (0, 0)),
                pl.BlockSpec((1, WC_in), lambda n: (0, 0)),
                pl.BlockSpec((WC_in, WC_mid), lambda n: (0, 0)),
                pl.BlockSpec((1, WC_mid), lambda n: (0, 0)),
                pl.BlockSpec((3, WC_mid, WC_out), lambda n: (0, 0, 0)),
            ],
            out_specs=pl.BlockSpec((B_blk, H, WC_out), lambda n: (n, 0, 0)),
        ),
        compiler_params=pltpu.CompilerParams(
            dimension_semantics=("parallel",)),
    )(x, s1, b1, w1_big, b2, w2_big)

    # (N, H, W*C_out) -> NCHW
    return jnp.transpose(out.reshape(N, H, W, C_out), (0, 3, 1, 2))


def ref_forward(x, params, eps=1e-5):
    """Pure-JAX reference (mirrors the PyTorch forward in eval mode)."""
    g1, be1, m1, v1, w1, g2, be2, m2, v2, w2 = params

    def bn(x, g, b, m, v):
        return (x - m[None, :, None, None]) / jnp.sqrt(v[None, :, None, None] + eps) \
               * g[None, :, None, None] + b[None, :, None, None]

    xn = jnp.maximum(bn(x, g1, be1, m1, v1), 0.0)
    h = lax.conv_general_dilated(xn, w1, (1, 1), 'VALID',
                                 dimension_numbers=('NCHW', 'OIHW', 'NCHW'))
    hn = jnp.maximum(bn(h, g2, be2, m2, v2), 0.0)
    out = lax.conv_general_dilated(hn, w2, (1, 1), ((1, 1), (1, 1)),
                                   dimension_numbers=('NCHW', 'OIHW', 'NCHW'))
    return out


if __name__ == "__main__":
    # module hyper-params: num_input_features=4, growth_rate=8, bn_size=4, drop_rate=0.0
    N, C_in, H, W = 2, 4, 16, 16
    growth_rate, bn_size = 8, 4
    C_mid = bn_size * growth_rate   # 32
    C_out = growth_rate             # 8

    key = jax.random.PRNGKey(0)
    keys = jax.random.split(key, 11)
    x = jax.random.normal(keys[0], (N, C_in, H, W), jnp.float32)

    params = (
        jax.random.normal(keys[1], (C_in,), jnp.float32) * 0.1 + 1.0,       # norm1 weight
        jax.random.normal(keys[2], (C_in,), jnp.float32) * 0.1,             # norm1 bias
        jax.random.normal(keys[3], (C_in,), jnp.float32) * 0.1,             # norm1 running_mean
        jnp.abs(jax.random.normal(keys[4], (C_in,), jnp.float32)) + 1.0,    # norm1 running_var
        jax.random.normal(keys[5], (C_mid, C_in, 1, 1), jnp.float32) * 0.2, # conv1 weight
        jax.random.normal(keys[6], (C_mid,), jnp.float32) * 0.1 + 1.0,      # norm2 weight
        jax.random.normal(keys[7], (C_mid,), jnp.float32) * 0.1,            # norm2 bias
        jax.random.normal(keys[8], (C_mid,), jnp.float32) * 0.1,            # norm2 running_mean
        jnp.abs(jax.random.normal(keys[9], (C_mid,), jnp.float32)) + 1.0,   # norm2 running_var
        jax.random.normal(keys[10], (C_out, C_mid, 3, 3), jnp.float32) * 0.1,  # conv2 weight
    )

    out = dense_layer_forward(x, params)
    out = jax.block_until_ready(out)

    ref = jax.block_until_ready(ref_forward(x, params))
    # bf16 MXU inputs with f32 accumulation -> loosened tolerance (~1% rel).
    np.testing.assert_allclose(np.asarray(out), np.asarray(ref),
                               rtol=3e-2, atol=3e-2)

    assert out.shape == (N, C_out, H, W)
    print("KERNEL_OK")
</pallas_src>

<mosaic_0001>
module attributes {stable_mosaic.version = 11 : i64} {
  func.func @kernel(%arg0: i32, %arg1: memref<1x16x64xf32, #tpu.memory_space<vmem>>, %arg2: memref<1x64xf32, #tpu.memory_space<vmem>>, %arg3: memref<1x64xf32, #tpu.memory_space<vmem>>, %arg4: memref<64x512xbf16, #tpu.memory_space<vmem>>, %arg5: memref<1x512xf32, #tpu.memory_space<vmem>>, %arg6: memref<3x512x128xbf16, #tpu.memory_space<vmem>>, %arg7: memref<1x16x128xf32, #tpu.memory_space<vmem>>) attributes {dimension_semantics = [#tpu.dimension_semantics<parallel>], iteration_bounds = array<i64: 2>, scalar_prefetch = 0 : i64, scratch_operands = 0 : i64, tpu.core_type = #tpu.core_type<tc>, window_params = [{transform_indices = @transform_0, window_bounds = array<i64: 1, 16, 64>}, {pipeline_mode = #tpu.pipeline_mode<synchronous>, transform_indices = @transform_1, window_bounds = array<i64: 1, 64>}, {pipeline_mode = #tpu.pipeline_mode<synchronous>, transform_indices = @transform_2, window_bounds = array<i64: 1, 64>}, {pipeline_mode = #tpu.pipeline_mode<synchronous>, transform_indices = @transform_3, window_bounds = array<i64: 64, 512>}, {pipeline_mode = #tpu.pipeline_mode<synchronous>, transform_indices = @transform_4, window_bounds = array<i64: 1, 512>}, {pipeline_mode = #tpu.pipeline_mode<synchronous>, transform_indices = @transform_5, window_bounds = array<i64: 3, 512, 128>}, {transform_indices = @transform_6, window_bounds = array<i64: 1, 16, 128>}]} {
    %c0 = arith.constant 0 : index
    %c0_0 = arith.constant 0 : index
    %c0_1 = arith.constant 0 : index
    %0 = vector.load %arg1[%c0, %c0_0, %c0_1] : memref<1x16x64xf32, #tpu.memory_space<vmem>>, vector<1x16x64xf32>
    %1 = vector.shape_cast %0 : vector<1x16x64xf32> to vector<16x64xf32>
    %c0_2 = arith.constant 0 : index
    %c0_3 = arith.constant 0 : index
    %2 = vector.load %arg2[%c0_2, %c0_3] : memref<1x64xf32, #tpu.memory_space<vmem>>, vector<1x64xf32>
    %3 = vector.broadcast %2 : vector<1x64xf32> to vector<16x64xf32>
    %4 = arith.mulf %1, %3 : vector<16x64xf32>
    %c0_4 = arith.constant 0 : index
    %c0_5 = arith.constant 0 : index
    %5 = vector.load %arg3[%c0_4, %c0_5] : memref<1x64xf32, #tpu.memory_space<vmem>>, vector<1x64xf32>
    %6 = vector.broadcast %5 : vector<1x64xf32> to vector<16x64xf32>
    %7 = arith.addf %4, %6 : vector<16x64xf32>
    %cst = arith.constant 0.000000e+00 : f32
    %8 = vector.broadcast %cst : f32 to vector<16x64xf32>
    %9 = arith.maximumf %7, %8 : vector<16x64xf32>
    %10 = arith.truncf %9 : vector<16x64xf32> to vector<16x64xbf16>
    %c0_6 = arith.constant 0 : index
    %c0_7 = arith.constant 0 : index
    %11 = vector.load %arg4[%c0_6, %c0_7] : memref<64x512xbf16, #tpu.memory_space<vmem>>, vector<64x512xbf16>
    %cst_8 = arith.constant dense<0.000000e+00> : vector<16x512xf32>
    %12 = tpu.matmul %10, %11, %cst_8 {dimension_numbers = #tpu.dot_dimension_numbers<[1], [0], [0], [1], [0, 0, 1, 1], [], []>} : vector<16x64xbf16>, vector<64x512xbf16>, vector<16x512xf32> -> vector<16x512xf32>
    %c0_9 = arith.constant 0 : index
    %c0_10 = arith.constant 0 : index
    %13 = vector.load %arg5[%c0_9, %c0_10] : memref<1x512xf32, #tpu.memory_space<vmem>>, vector<1x512xf32>
    %14 = vector.broadcast %13 : vector<1x512xf32> to vector<16x512xf32>
    %15 = arith.addf %12, %14 : vector<16x512xf32>
    %cst_11 = arith.constant 0.000000e+00 : f32
    %16 = vector.broadcast %cst_11 : f32 to vector<16x512xf32>
    %17 = arith.maximumf %15, %16 : vector<16x512xf32>
    %18 = tpu.iota {dimensions = array<i32: 0>} : vector<16x1xi32>
    %c16_i32 = arith.constant 16 : i32
    %c0_i32 = arith.constant 0 : i32
    %19 = arith.cmpi eq, %c16_i32, %c0_i32 : i32
    %c1_i32 = arith.constant 1 : i32
    %20 = arith.select %19, %c1_i32, %c16_i32 : i32
    %21 = vector.broadcast %20 : i32 to vector<16x1xi32>
    %22 = arith.remsi %18, %21 : vector<16x1xi32>
    %c0_i32_12 = arith.constant 0 : i32
    %23 = vector.broadcast %c0_i32_12 : i32 to vector<16x1xi32>
    %24 = arith.cmpi ne, %22, %23 : vector<16x1xi32>
    %c0_i32_13 = arith.constant 0 : i32
    %25 = vector.broadcast %c0_i32_13 : i32 to vector<16x1xi32>
    %26 = arith.cmpi slt, %22, %25 : vector<16x1xi32>
    %c0_i32_14 = arith.constant 0 : i32
    %27 = arith.cmpi slt, %20, %c0_i32_14 : i32
    %28 = vector.broadcast %27 : i1 to vector<16x1xi1>
    %29 = vector.broadcast %28 : vector<16x1xi1> to vector<16x1xi1>
    %30 = arith.xori %26, %29 : vector<16x1xi1>
    %31 = arith.andi %30, %24 : vector<16x1xi1>
    %32 = vector.broadcast %20 : i32 to vector<16x1xi32>
    %33 = arith.addi %22, %32 : vector<16x1xi32>
    %34 = arith.select %31, %33, %22 : vector<16x1xi1>, vector<16x1xi32>
    %c0_i32_15 = arith.constant 0 : i32
    %35 = vector.broadcast %c0_i32_15 : i32 to vector<16x1xi32>
    %36 = arith.cmpi ne, %34, %35 : vector<16x1xi32>
    %37 = arith.extui %36 : vector<16x1xi1> to vector<16x1xi32>
    %38 = arith.sitofp %37 : vector<16x1xi32> to vector<16x1xf32>
    %c15_i32 = arith.constant 15 : i32
    %39 = vector.broadcast %c15_i32 : i32 to vector<16x1xi32>
    %40 = arith.cmpi ne, %34, %39 : vector<16x1xi32>
    %41 = arith.extui %40 : vector<16x1xi1> to vector<16x1xi32>
    %42 = arith.sitofp %41 : vector<16x1xi32> to vector<16x1xf32>
    %c1_i32_16 = arith.constant 1 : i32
    %43 = tpu.dynamic_rotate %17 by %c1_i32_16 dim 0 : vector<16x512xf32>, i32 -> vector<16x512xf32>
    %44 = vector.broadcast %38 : vector<16x1xf32> to vector<16x512xf32>
    %45 = arith.mulf %43, %44 : vector<16x512xf32>
    %c15_i32_17 = arith.constant 15 : i32
    %46 = tpu.dynamic_rotate %17 by %c15_i32_17 dim 0 : vector<16x512xf32>, i32 -> vector<16x512xf32>
    %47 = vector.broadcast %42 : vector<16x1xf32> to vector<16x512xf32>
    %48 = arith.mulf %46, %47 : vector<16x512xf32>
    %49 = arith.truncf %45 : vector<16x512xf32> to vector<16x512xbf16>
    %c0_18 = arith.constant 0 : index
    %c0_19 = arith.constant 0 : index
    %c0_20 = arith.constant 0 : index
    %50 = vector.load %arg6[%c0_18, %c0_19, %c0_20] : memref<3x512x128xbf16, #tpu.memory_space<vmem>>, vector<1x512x128xbf16>
    %51 = vector.shape_cast %50 : vector<1x512x128xbf16> to vector<512x128xbf16>
    %cst_21 = arith.constant dense<0.000000e+00> : vector<16x128xf32>
    %52 = tpu.matmul %49, %51, %cst_21 {dimension_numbers = #tpu.dot_dimension_numbers<[1], [0], [0], [1], [0, 0, 1, 1], [], []>} : vector<16x512xbf16>, vector<512x128xbf16>, vector<16x128xf32> -> vector<16x128xf32>
    %53 = arith.truncf %17 : vector<16x512xf32> to vector<16x512xbf16>
    %c1 = arith.constant 1 : index
    %c0_22 = arith.constant 0 : index
    %c0_23 = arith.constant 0 : index
    %54 = vector.load %arg6[%c1, %c0_22, %c0_23] : memref<3x512x128xbf16, #tpu.memory_space<vmem>>, vector<1x512x128xbf16>
    %55 = vector.shape_cast %54 : vector<1x512x128xbf16> to vector<512x128xbf16>
    %cst_24 = arith.constant dense<0.000000e+00> : vector<16x128xf32>
    %56 = tpu.matmul %53, %55, %cst_24 {dimension_numbers = #tpu.dot_dimension_numbers<[1], [0], [0], [1], [0, 0, 1, 1], [], []>} : vector<16x512xbf16>, vector<512x128xbf16>, vector<16x128xf32> -> vector<16x128xf32>
    %57 = arith.addf %52, %56 : vector<16x128xf32>
    %58 = arith.truncf %48 : vector<16x512xf32> to vector<16x512xbf16>
    %c2 = arith.constant 2 : index
    %c0_25 = arith.constant 0 : index
    %c0_26 = arith.constant 0 : index
    %59 = vector.load %arg6[%c2, %c0_25, %c0_26] : memref<3x512x128xbf16, #tpu.memory_space<vmem>>, vector<1x512x128xbf16>
    %60 = vector.shape_cast %59 : vector<1x512x128xbf16> to vector<512x128xbf16>
    %cst_27 = arith.constant dense<0.000000e+00> : vector<16x128xf32>
    %61 = tpu.matmul %58, %60, %cst_27 {dimension_numbers = #tpu.dot_dimension_numbers<[1], [0], [0], [1], [0, 0, 1, 1], [], []>} : vector<16x512xbf16>, vector<512x128xbf16>, vector<16x128xf32> -> vector<16x128xf32>
    %62 = arith.addf %57, %61 : vector<16x128xf32>
    %63 = vector.shape_cast %62 : vector<16x128xf32> to vector<1x16x128xf32>
    %c0_28 = arith.constant 0 : index
    %c0_29 = arith.constant 0 : index
    %c0_30 = arith.constant 0 : index
    %64 = vector.load %arg7[%c0_28, %c0_29, %c0_30] : memref<1x16x128xf32, #tpu.memory_space<vmem>>, vector<1x16x128xf32>
    tpu.vector_store %arg7[%c0_28, %c0_29, %c0_30], %63 {strides = array<i32>} : memref<1x16x128xf32, #tpu.memory_space<vmem>>, vector<1x16x128xf32>,
    return
  }
  func.func @transform_0(%arg0: i32) -> (i32, i32, i32) {
    %c0_i32 = arith.constant 0 : i32
    %c0_i32_0 = arith.constant 0 : i32
    %c0_i32_1 = arith.constant 0 : i32
    return %arg0, %c0_i32, %c0_i32_0 : i32, i32, i32
  }
  func.func @transform_1(%arg0: i32) -> (i32, i32) {
    %c0_i32 = arith.constant 0 : i32
    %c0_i32_0 = arith.constant 0 : i32
    %c0_i32_1 = arith.constant 0 : i32
    return %c0_i32, %c0_i32_0 : i32, i32
  }
  func.func @transform_2(%arg0: i32) -> (i32, i32) {
    %c0_i32 = arith.constant 0 : i32
    %c0_i32_0 = arith.constant 0 : i32
    %c0_i32_1 = arith.constant 0 : i32
    return %c0_i32, %c0_i32_0 : i32, i32
  }
  func.func @transform_3(%arg0: i32) -> (i32, i32) {
    %c0_i32 = arith.constant 0 : i32
    %c0_i32_0 = arith.constant 0 : i32
    %c0_i32_1 = arith.constant 0 : i32
    return %c0_i32, %c0_i32_0 : i32, i32
  }
  func.func @transform_4(%arg0: i32) -> (i32, i32) {
    %c0_i32 = arith.constant 0 : i32
    %c0_i32_0 = arith.constant 0 : i32
    %c0_i32_1 = arith.constant 0 : i32
    return %c0_i32, %c0_i32_0 : i32, i32
  }
  func.func @transform_5(%arg0: i32) -> (i32, i32, i32) {
    %c0_i32 = arith.constant 0 : i32
    %c0_i32_0 = arith.constant 0 : i32
    %c0_i32_1 = arith.constant 0 : i32
    %c0_i32_2 = arith.constant 0 : i32
    return %c0_i32, %c0_i32_0, %c0_i32_1 : i32, i32, i32
  }
  func.func @transform_6(%arg0: i32) -> (i32, i32, i32) {
    %c0_i32 = arith.constant 0 : i32
    %c0_i32_0 = arith.constant 0 : i32
    %c0_i32_1 = arith.constant 0 : i32
    return %arg0, %c0_i32, %c0_i32_0 : i32, i32, i32
  }
}

</mosaic_0001>

<bundles_post_ra>
// kernel: tpu_custom_call.1
= control target key start
LH: loop header
LB: loop body
LE: loop exit
PB: predicated region body
PF: predicated region fallthrough
CT: control target
= control target key end

     0   :  { %11 = vsyncpa [#allocation3], 0  ;;  %s2825_s0 = inlined_call_operand.hbm [shape: f32[2,16,64], index: 0, kind: input, shape index: {}]   ;;  %s2826_s1 = inlined_call_operand.vmem [shape: f32[1,64], index: 1, kind: input, shape index: {}]   ;;  %s2827_s2 = inlined_call_operand.vmem [shape: f32[1,64], index: 2, kind: input, shape index: {}]   ;;  %s2828_s3 = inlined_call_operand.hbm [shape: bf16[64,512], index: 3, kind: input, shape index: {}]   ;;  %s2829_s4 = inlined_call_operand.vmem [shape: f32[1,512], index: 4, kind: input, shape index: {}]   ;;  %s2830_s5 = inlined_call_operand.hbm [shape: bf16[3,512,128], index: 5, kind: input, shape index: {}]   ;;  %s2831_s6 = inlined_call_operand.hbm [shape: f32[2,16,128], index: 6, kind: output, shape index: {}]  }
   0x1   :  { %13 = vsyncpa [#allocation3 + $0x1], 0 }
   0x2   :  { %14 = vsyncpa [#allocation6], 0 }
   0x3   :  { %15 = vsyncpa [#allocation4], 0 }
   0x4   :  { %17 = vsyncpa [#allocation4 + $0x1], 0  ;;  %s2440_s21 = smov 0   ;;  %s2442_s22 = smov 0  }
   0x5   :  { %s2444_s23 = smov 0   ;;  %s2446_s24 = smov 0  }
   0x6 LB: > { %s2461_s25 = sadd.s32 4294967295, %s2389_s24   ;;  %s1766_s26 = sadd.s32 4294967294, %s2389_s24   ;;  %s2389_s24 = sphi %s2446_s24, %s2853_s24   ;;  %s2385_s23 = sphi %s2444_s23, %s2852_s23   ;;  %s2381_s22 = sphi %s2442_s22, %s2851_s22   ;;  %s2377_s21 = sphi %s2440_s21, %s2850_s21  }
   0x7   : > { %p43_p0 = scmp.ne.s32.totalorder %s2381_s22, %s2377_s21  ;;  %p2832_p1 = scmp.eq.s32.totalorder %s2461_s25, 0 }
   0x8   : > { %p178_p3 = scmp.eq.s32.totalorder %s1766_s26, 1  ;;  %p1767_p5 = scmp.ge.s32.totalorder %s2389_s24, 1 }
   0x9   : > { %p2470_p4 = por %p2832_p1, %p43_p0  ;;  %p185_p7 = scmp.lt.s32.totalorder %s2389_s24, 3 }
   0xa   : > { %p2475_p6 = por %p178_p3, %p43_p0  ;;  %s2391_s30 = smov [#allocation5]  }
   0xb   : > { %s2835_s27 = scalar_select %p2470_p4, 1, 0 }
   0xc   : > { %s2836_s28 = scalar_select %p2475_p6, 1, 0 }
   0xd   : > { %p2480_p8 = pnand %p1767_p5, %p185_p7  ;;  %s203_s7 = sshll.u32 %s2391_s30, 4  ;;  %s2484_s7 = int_to_ptr.vmem [resolvable:$true] %s203_s7 }
   0xe   : > { %s2392_s9 = smov [#allocation7]   ;;  %s2233_s13 = scalar_lea.hbm %s2828_s3, 2048 }
   0xf   : > { %p2048_p9 = pneg %p2480_p8  ;;  %s219_s10 = sshll.u32 %s2392_s9, 4  ;;  %s2495_s10 = int_to_ptr.vmem [resolvable:$true] %s219_s10 }
  0x10   : > { %p2234_p12 = scmp.ne.s32.totalorder %s2828_s3, %s2233_s13  ;;  %p2240_p5 = scmp.lt.u32.totalorder %s2233_s13, %s2828_s3 }
  0x11   : > { %p2491_p11 = pnand %p2048_p9, %p2832_p1 }
  0x13   : > { %p2235_p13 = pneg %p2491_p11 }
  0x15   : > { %p2236_p0 = pnand %p2235_p13, %p2234_p12 }
  0x17   : > { %p2237_p3 = pneg %p2236_p0 }
  0x19   : > { %p2242_p7 = pnand %p2240_p5, %p2237_p3 }
  0x1b   : > { %2245 = shalt.err (!%p2242_p7)
}
  0x1c   : > { %s2246_s18 = scalar_lea.vmem %s2484_s7, 2048  ;;  %p2254_p2 = scmp.lt.s32.totalorder %s2484_s7, %s2484_s7 }
  0x1d   : > { %p2247_p9 = scmp.ne.s32.totalorder %s2484_s7, %s2246_s18  ;;  %p2255_p12 = scmp.lt.s32.totalorder %s2246_s18, %s2246_s18 }
  0x1f   : > { %p2249_p10 = pnand %p2247_p9, %p2235_p13  ;;  %p2256_p0 = por %p2255_p12, %p2254_p2 }
  0x21   : > { %p2250_p1 = pneg %p2249_p10 }
  0x23   : > { %p2257_p6 = pnand %p2256_p0, %p2250_p1 }
  0x25   : > { %2260 = shalt.err (!%p2257_p6)
}
  0x26   : > { %s2393_s19 = smov 256   ;;  %s2394_s20 = smov 16  }
  0x27   : > { %2051 = dma.hbm_to_vmem [thread:$0]  (!%p2491_p11), %s2828_s3, 2048, %s2484_s7, [#allocation6], %s2393_s19, %s2393_s19, %s2394_s20  }
  0x28   : > { %s2261_s12 = scalar_lea.hbm %s2830_s5, 12288 }
  0x29   : > { %p2262_p2 = scmp.ne.s32.totalorder %s2830_s5, %s2261_s12  ;;  %p2268_p10 = scmp.lt.u32.totalorder %s2261_s12, %s2830_s5 }
  0x2b   : > { %p2264_p1 = pnand %p2262_p2, %p2235_p13 }
  0x2d   : > { %p2265_p6 = pneg %p2264_p1 }
  0x2f   : > { %p2270_p3 = pnand %p2268_p10, %p2265_p6 }
  0x31   : > { %2273 = shalt.err (!%p2270_p3)
}
  0x32   : > { %s2274_s7 = scalar_lea.vmem %s2495_s10, 12288  ;;  %p2282_p12 = scmp.lt.s32.totalorder %s2495_s10, %s2495_s10 }
  0x33   : > { %p2275_p5 = scmp.ne.s32.totalorder %s2495_s10, %s2274_s7  ;;  %p2283_p0 = scmp.lt.s32.totalorder %s2274_s7, %s2274_s7 }
  0x35   : > { %p2277_p7 = pnand %p2275_p5, %p2235_p13  ;;  %p2284_p2 = por %p2283_p0, %p2282_p12 }
  0x37   : > { %p2278_p9 = pneg %p2277_p7 }
  0x39   : > { %p2285_p1 = pnand %p2284_p2, %p2278_p9 }
  0x3b   : > { %2288 = shalt.err (!%p2285_p1)
}
  0x3c   : > { %s2395_s17 = smov 64   ;;  %s2396_s18 = smov 4  }
  0x3d   : > { %2054 = dma.hbm_to_vmem [thread:$0]  (!%p2491_p11), %s2830_s5, 12288, %s2495_s10, [#allocation6], %s2395_s17, %s2395_s17, %s2396_s18  }
  0x3e   : > { %s2550_s26 = sadd.s32 1, %s2389_s24   ;;  %s30_s9 = sadd.s32 1, %s2385_s23 }
  0x3f   : > { %s27_s30 = ssub.s32 %s2389_s24, %s2550_s26  ;;  %p37_p6 = scmp.ne.s32.totalorder %s2385_s23, %s2381_s22 }
  0x40   : > { %p28_p13 = scmp.eq.s32.totalorder %s27_s30, 0  ;;  %p38_p10 = scmp.eq.s32.totalorder %s2389_s24, 0 }
  0x41   : > { %p2839_p5 = scmp.eq.s32.totalorder %s2461_s25, 1  ;;  %p2065_p9 = scmp.lt.s32.totalorder %s2389_s24, 2 }
  0x42   : > { %s2559_s11 = scalar_select %p28_p13, %s2385_s23, %s30_s9  }
  0x43   : > { %p39_p3 = por %p38_p10, %p37_p6  ;;  %p2563_p7 = por %p2839_p5, %p37_p6 }
  0x44   : > { %s233_s8 = sand.u32 1, %s2385_s23   ;;  %s1902_s10 = sshll.u32 %s2389_s24, 8 }
  0x45   : > { %s2840_s12 = scalar_select %p2563_p7, 1, 0 }
  0x46   : > { %s1771_s13 = sshll.u32 %s233_s8, 4  ;;  %s2573_s16 = scalar_lea.hbm %s2825_s0, %s1902_s10 }
  0x47   : > { %s237_s7 = scalar_lea.vmem [#allocation2], %s1771_s13  ;;  %p2577_p11 = pnand %p2065_p9, %p39_p3 }
  0x48   : > { %s244_s17 = sshll.u32 %s237_s7, 4  ;;  %s2581_s19 = scalar_lea.sflag [#allocation3], %s233_s8  ;;  %s2575_s17 = int_to_ptr.vmem [resolvable:$true] %s244_s17 }
  0x49   : > { %s2289_s20 = scalar_lea.hbm %s2573_s16, 256  ;;  %p2291_p0 = pneg %p2577_p11 }
  0x4a   : > { %p2290_p12 = scmp.ne.s32.totalorder %s2573_s16, %s2289_s20  ;;  %s2294_s13 = scalar_lea.hbm %s2825_s0, 512 }
  0x4b   : > { %p2295_p13 = scmp.lt.u32.totalorder %s2573_s16, %s2825_s0  ;;  %p2296_p6 = scmp.lt.u32.totalorder %s2294_s13, %s2289_s20 }
  0x4c   : > { %p2292_p2 = pnand %p2291_p0, %p2290_p12  ;;  %p2298_p3 = scmp.lt.u32.totalorder %s2289_s20, %s2573_s16 }
  0x4d   : > { %p2297_p10 = por %p2296_p6, %p2295_p13 }
  0x4e   : > { %p2293_p1 = pneg %p2292_p2 }
  0x4f   : > { %p2299_p5 = por %p2298_p3, %p2297_p10 }
  0x51   : > { %p2300_p9 = pnand %p2299_p5, %p2293_p1 }
  0x53   : > { %2303 = shalt.err (!%p2300_p9)
}
  0x54   : > { %s2304_s8 = scalar_lea.vmem %s2575_s17, 256  ;;  %s2397_s15 = smov [#allocation2]  }
  0x55   : > { %p2305_p12 = scmp.ne.s32.totalorder %s2575_s17, %s2304_s8  ;;  %s2309_s7 = sshll.u32 %s2397_s15, 4  ;;  %s2310_s7 = int_to_ptr.vmem [resolvable:$false] %s2309_s7 }
  0x56   : > { %s2311_s30 = scalar_lea.vmem %s2310_s7, 512  ;;  %p2312_p4 = scmp.lt.s32.totalorder %s2575_s17, %s2310_s7 }
  0x57   : > { %p2307_p2 = pnand %p2305_p12, %p2291_p0  ;;  %p2313_p13 = scmp.lt.s32.totalorder %s2311_s30, %s2304_s8 }
  0x59   : > { %p2308_p7 = pneg %p2307_p2  ;;  %p2314_p6 = por %p2313_p13, %p2312_p4 }
  0x5b   : > { %p2315_p10 = pnand %p2314_p6, %p2308_p7 }
  0x5d   : > { %2318 = shalt.err (!%p2315_p10)
}
  0x5e   : > { %s2398_s20 = smov 128   ;;  %s2399_s9 = smov 8  }
  0x5f   : > { %2058 = dma.hbm_to_vmem [thread:$0]  (!%p2577_p11), %s2573_s16, 256, %s2575_s17, %s2581_s19, %s2398_s20, %s2398_s20, %s2399_s9  }
  0x60   : > { %256 = sbr.rel (%p2480_p8) target bundleno = 651 (0x28b), region = 44  ;;  %s2612_s13 = sand.u32 (!%p2480_p8), 1, %s2381_s22  }
  0x61   : > { %s1775_s10 = sshll.u32 (!%p2480_p8), %s2612_s13, 4  ;;  %s259_s14 = scalar_lea.sflag (!%p2480_p8), [#allocation3], %s2612_s13 }
  0x62   : > { %s2618_s8 = scalar_lea.vmem (!%p2480_p8), [#allocation2], %s1775_s10  ;;  %p2842_p4 = scmp.ne.s32.totalorder (!%p2480_p8), %s2835_s27, 0 }
  0x67   : > { %2364 = dma.done.wait (%p2842_p4), %s259_s14, 256  }
  0x68   : > { %2366 = vsyncadd (%p2842_p4), %s259_s14, 4294967040  ;;  %p2843_p7 = scmp.eq.s32.totalorder %s2461_s25, 0 }
  0x6a   : > { %2368 = dma.done.wait (%p2843_p7), [#allocation6], 14336   ;;  %p2844_p8 = pmov %p2843_p7 }
  0x6b   : > { %v2400_v0 = vmov 0   ;;  %v2113_v1 = vld [vmem:[#allocation5 + $0x4] ss:$16 sps:$4 sm:$0xff]   ;;  %v2115_v2 = vld [vmem:[#allocation5 + $0xc] ss:$16 sps:$4 sm:$0xff]   ;;  %vm441_vm0 = vcmask 523264   ;;  %v341_v62 = vlaneseq }
  0x6c   : > { %2370 = vsyncadd (%p2844_p8), [#allocation6], 4294952960  ;;  %477 = vmatprep.mubr.bf16.mxu0 %v2400_v0  ;;  %520 = vmatprep.mubr.bf16.mxu1 %v2400_v0  ;;  %v2117_v3 = vld [vmem:[#allocation5] ss:$16 sps:$4 sm:$0xff]   ;;  %v2118_v4 = vld [vmem:[#allocation5 + $0x8] ss:$16 sps:$4 sm:$0xff]  }
  0x6d   : > { %445 = vmatprep.subr.bf16.mxu0 %v2113_v1  ;;  %488 = vmatprep.subr.bf16.mxu1 %v2115_v2  ;;  %v2119_v5 = vld [vmem:[#allocation5 + $0x24] ss:$16 sps:$4 sm:$0xff]   ;;  %v2121_v6 = vld [vmem:[#allocation5 + $0x2c] ss:$16 sps:$4 sm:$0xff]   ;;  %v2123_v7 = vld [vmem:[#allocation5 + $0x20] ss:$16 sps:$4 sm:$0xff]  }
  0x6e   : > { %446 = vmatpush1.bf16.msra.mxu0 %v2117_v3  ;;  %489 = vmatpush1.bf16.msra.mxu1 %v2118_v4  ;;  %v2124_v8 = vld [vmem:[#allocation5 + $0x28] ss:$16 sps:$4 sm:$0xff]   ;;  %v2125_v9 = vld [vmem:[#allocation5 + $0x44] ss:$16 sps:$4 sm:$0xff]   ;;  %v2127_v10 = vld [vmem:[#allocation5 + $0x4c] ss:$16 sps:$4 sm:$0xff]  }
  0x6f   : > { %447 = vmatprep.subr.bf16.mxu0 %v2119_v5  ;;  %490 = vmatprep.subr.bf16.mxu1 %v2121_v6  ;;  %v2129_v11 = vld [vmem:[#allocation5 + $0x40] ss:$16 sps:$4 sm:$0xff]   ;;  %v2130_v12 = vld [vmem:[#allocation5 + $0x48] ss:$16 sps:$4 sm:$0xff]   ;;  %v2131_v13 = vld [vmem:[#allocation5 + $0x64] ss:$16 sps:$4 sm:$0xff]  }
  0x70   : > { %v2133_v14 = vld [vmem:[#allocation5 + $0x6c] ss:$16 sps:$4 sm:$0xff]   ;;  %v2135_v15 = vld [vmem:[#allocation5 + $0x60] ss:$16 sps:$4 sm:$0xff]   ;;  %v2136_v16 = vld [vmem:[#allocation5 + $0x68] ss:$16 sps:$4 sm:$0xff]  }
  0x71   : > { %v300_v17 = vld [vmem:[%s2618_s8] sm:$0xff]  ;;  %v301_v18 = vld [vmem:[%s2618_s8 + $0x8] sm:$0xff]  ;;  %v2636_v63 = vshrl.u32 %v341_v62, 7  ;;  %s298_s15 = scalar_lea.vmem [#allocation8], %s1775_s10  ;;  %s1903_s30 = sshll.u32 %s2461_s25, 8 }
  0x72   : > { %448 = vmatpush1.bf16.msra.mxu0 %v2123_v7  ;;  %491 = vmatpush1.bf16.msra.mxu1 %v2124_v8  ;;  %v1779_v19 = vld [vmem:[%s2826_s1] ss:$0 sm:$0xff]  ;;  %v2141_v31 = vld [vmem:[#allocation7 + $0x148] sm:$0xff]   ;;  %v2145_v36 = vld [vmem:[#allocation7 + $0x150] sm:$0xff]   ;;  %s1674_s7 = sshll.u32 %s298_s15, 4  ;;  %s2781_s14 = scalar_lea.hbm %s2831_s6, %s1903_s30  ;;  %s2776_s7 = int_to_ptr.vmem [resolvable:$true] %s1674_s7 }
  0x73   : > { %449 = vmatprep.subr.bf16.mxu0 %v2125_v9  ;;  %492 = vmatprep.subr.bf16.mxu1 %v2127_v10  ;;  %v1780_v20 = vld [vmem:[%s2827_s2] ss:$0 sm:$0xff]  ;;  %v309_v21 = vmul.f32 %v1779_v19, %v300_v17  ;;  %v310_v22 = vmul.f32 %v1779_v19, %v301_v18  ;;  %v2142_v33 = vld [vmem:[#allocation7 + $0x1c8] sm:$0xff]   ;;  %v2146_v37 = vld [vmem:[#allocation7 + $0x1d0] sm:$0xff]   ;;  %v343_v0 = vsub.s32 0, %v2636_v63  ;;  %v351_v1 = vsub.s32 2, %v2636_v63 }
  0x74   : > { %v2137_v23 = vld [vmem:[#allocation7 + $0x140] sm:$0xff]   ;;  %v2143_v34 = vld [vmem:[#allocation7 + $0x108] sm:$0xff]   ;;  %v2147_v38 = vld [vmem:[#allocation7 + $0x110] sm:$0xff]   ;;  %v347_v3 = vsub.s32 1, %v2636_v63  ;;  %v355_v4 = vsub.s32 3, %v2636_v63  ;;  %v541_v7 = vadd.s32 8, %v2636_v63 }
  0x75   : > { %v2138_v24 = vld [vmem:[#allocation7 + $0x1c0] sm:$0xff]   ;;  %v318_v25 = vadd.f32 %v1780_v20, %v309_v21  ;;  %v319_v26 = vadd.f32 %v1780_v20, %v310_v22  ;;  %v2144_v35 = vld [vmem:[#allocation7 + $0x188] sm:$0xff]   ;;  %v2148_v39 = vld [vmem:[#allocation7 + $0x190] sm:$0xff]   ;;  %v546_v10 = vand.u32 15, %v2636_v63  ;;  %vm586_vm2 = vcmp.lt.s32.totalorder %v2636_v63, 1  ;;  %s1661_s10 = scalar_lea.sflag [#allocation4], %s2612_s13 }
  0x76   : > { %450 = vmatpush1.bf16.msra.mxu0 %v2129_v11  ;;  %493 = vmatpush1.bf16.msra.mxu1 %v2130_v12  ;;  %v2139_v27 = vld [vmem:[#allocation7 + $0x100] sm:$0xff]   ;;  %v2149_v40 = vld [vmem:[#allocation7 + $0x158] sm:$0xff]   ;;  %v2157_v48 = vld [vmem:[#allocation7 + $0x168] sm:$0xff]   ;;  %v553_v17 = vand.u32 15, %v541_v7  ;;  %vm611_vm3 = vcmp.lt.s32.totalorder %v2636_v63, 7  ;;  %s2319_s8 = scalar_lea.vmem %s2776_s7, 256 }
  0x77   : > { %451 = vmatprep.subr.bf16.mxu0 %v2131_v13  ;;  %494 = vmatprep.subr.bf16.mxu1 %v2133_v14  ;;  %v2140_v28 = vld [vmem:[#allocation7 + $0x180] sm:$0xff]   ;;  %v320_v29 = vmax.f32 %v318_v25, 0.0  ;;  %v321_v30 = vmax.f32 %v319_v26, 0.0  ;;  %v2150_v41 = vld [vmem:[#allocation7 + $0x1d8] sm:$0xff]   ;;  %v2158_v49 = vld [vmem:[#allocation7 + $0x1e8] sm:$0xff]   ;;  %vm566_vm1 = vcmp.ne.s32.totalorder %v546_v10, 0  ;;  %p2320_p11 = scmp.ne.s32.totalorder %s2776_s7, %s2319_s8 }
  0x78   : > { %v2151_v42 = vld [vmem:[#allocation7 + $0x118] sm:$0xff]   ;;  %v2153_v44 = vld [vmem:[#allocation7 + $0x160] sm:$0xff]   ;;  %v2159_v50 = vld [vmem:[#allocation7 + $0x128] sm:$0xff]   ;;  %vm2659_vm4 = vcmp.ne.s32.totalorder %v553_v17, 15  ;;  %p2847_p0 = scmp.ne.s32.totalorder %s2840_s12, 0  ;;  %s2402_s25 = smov [#allocation8]  }
  0x79   : > { %v322_v32 = vpack.c.bf16 %v321_v30, %v320_v29  ;;  %v2152_v43 = vld [vmem:[#allocation7 + $0x198] sm:$0xff]   ;;  %v2154_v45 = vld [vmem:[#allocation7 + $0x1e0] sm:$0xff]   ;;  %v2160_v51 = vld [vmem:[#allocation7 + $0x1a8] sm:$0xff]   ;;  %s2323_s27 = sshll.u32 %s2402_s25, 4  ;;  %s2324_s27 = int_to_ptr.vmem [resolvable:$false] %s2323_s27 }
  0x7a   : > { %452 = vmatpush1.bf16.msra.mxu0 %v2135_v15  ;;  %495 = vmatpush1.bf16.msra.mxu1 %v2136_v16  ;;  %v2155_v46 = vld [vmem:[#allocation7 + $0x120] sm:$0xff]   ;;  %v2161_v52 = vld [vmem:[#allocation7 + $0x170] sm:$0xff]   ;;  %v2165_v56 = vld [vmem:[#allocation7 + $0x178] sm:$0xff]   ;;  %p2321_p1 = pnand %p2320_p11, %p2847_p0  ;;  %s2325_s29 = scalar_lea.vmem %s2324_s27, 512 }
  0x7b   : > { %1904 = vmatprep.subr.bf16.mxu0 %v2137_v23  ;;  %1926 = vmatprep.subr.bf16.mxu1 %v2138_v24  ;;  %v2156_v47 = vld [vmem:[#allocation7 + $0x1a0] sm:$0xff]   ;;  %v2162_v53 = vld [vmem:[#allocation7 + $0x1f0] sm:$0xff]   ;;  %v2166_v57 = vld [vmem:[#allocation7 + $0x1f8] sm:$0xff]   ;;  %p2326_p5 = scmp.lt.s32.totalorder %s2776_s7, %s2324_s27  ;;  %p2327_p9 = scmp.lt.s32.totalorder %s2325_s29, %s2319_s8 }
  0x7c   : > { %v2163_v54 = vld [vmem:[#allocation7 + $0x130] sm:$0xff]   ;;  %v2167_v58 = vld [vmem:[#allocation7 + $0x138] sm:$0xff]   ;;  %v2169_v60 = vld [vmem:[#allocation7 + $0x40] sm:$0xff]   ;;  %p2322_p3 = pneg %p2321_p1 }
  0x7d   : > { %1797 = vmatmul.mubr.msk.bf16.vlgmr.msra.gmra.mrb[0].mxu0 %vm441_vm0, %v322_v32  ;;  %1798 = vmatmul.mubr.msk.bf16.vlgmr.msra.gmra.mrb[0].mxu1 %vm441_vm0, %v322_v32  ;;  %v2164_v55 = vld [vmem:[#allocation7 + $0x1b0] sm:$0xff]   ;;  %v2168_v59 = vld [vmem:[#allocation7 + $0x1b8] sm:$0xff]   ;;  %v2170_v61 = vld [vmem:[#allocation7 + $0xc0] sm:$0xff]   ;;  %p2328_p12 = por %p2327_p9, %p2326_p5 }
  0x7e   : > { %1905 = vmatpush3.bf16.msra.mxu0 %v2139_v27  ;;  %1927 = vmatpush3.bf16.msra.mxu1 %v2140_v28  ;;  %v339_v2 = vld [vmem:[%s2829_s4] sm:$0xf]  ;;  %v2176_v17 = vld [vmem:[#allocation7 + $0x88] sm:$0xff]  }
  0x7f   : > { %1906 = vmatprep.subr.bf16.mxu0 %v2141_v31  ;;  %1928 = vmatprep.subr.bf16.mxu1 %v2142_v33  ;;  %v344_v5 = vrot.slane %v339_v2, %v343_v0  ;;  %v352_v6 = vrot.slane %v339_v2, %v351_v1  ;;  %v348_v8 = vrot.slane %v339_v2, %v347_v3  ;;  %v2401_v31 = vmov 0.0   ;;  %v2172_v62 = vld [vmem:[#allocation7 + $0x80] sm:$0xff]   ;;  %v2173_v0 = vld [vmem:[#allocation7 + $0x48] sm:$0xff]   ;;  %p2329_p2 = pnand %p2328_p12, %p2322_p3 }
  0x80   : > { %v356_v9 = vrot.slane %v339_v2, %v355_v4  ;;  %v1799_v32 = vsel %vm566_vm1, 1.0, %v2401_v31  ;;  %v2174_v1 = vld [vmem:[#allocation7 + $0xc8] sm:$0xff]  }
  0x82   : > { %1907 = vmatpush3.bf16.msra.mxu0 %v2143_v34  ;;  %1929 = vmatpush3.bf16.msra.mxu1 %v2144_v35 }
  0x83   : > { %1908 = vmatprep.subr.bf16.mxu0 %v2145_v36  ;;  %1930 = vmatprep.subr.bf16.mxu1 %v2146_v37  ;;  %v2180_v36 = vld [vmem:[#allocation7 + $0x90] sm:$0xff]  }
  0x86   : > { %1909 = vmatpush3.bf16.msra.mxu0 %v2147_v38  ;;  %1931 = vmatpush3.bf16.msra.mxu1 %v2148_v39 }
  0x87   : > { %1910 = vmatprep.subr.bf16.mxu0 %v2149_v40  ;;  %1932 = vmatprep.subr.bf16.mxu1 %v2150_v41 }
  0x8a   : > { %1911 = vmatpush3.bf16.msra.mxu0 %v2151_v42  ;;  %1933 = vmatpush3.bf16.msra.mxu1 %v2152_v43 }
  0x8b   : > { %1912 = vmatprep.subr.bf16.mxu0 %v2153_v44  ;;  %1934 = vmatprep.subr.bf16.mxu1 %v2154_v45 }
  0x8e   : > { %1913 = vmatpush3.bf16.msra.mxu0 %v2155_v46  ;;  %1935 = vmatpush3.bf16.msra.mxu1 %v2156_v47 }
  0x8f   : > { %1914 = vmatprep.subr.bf16.mxu0 %v2157_v48  ;;  %1936 = vmatprep.subr.bf16.mxu1 %v2158_v49 }
  0x92   : > { %1915 = vmatpush3.bf16.msra.mxu0 %v2159_v50  ;;  %1937 = vmatpush3.bf16.msra.mxu1 %v2160_v51 }
  0x93   : > { %1916 = vmatprep.subr.bf16.mxu0 %v2161_v52  ;;  %1938 = vmatprep.subr.bf16.mxu1 %v2162_v53 }
  0x96   : > { %1917 = vmatpush3.bf16.msra.mxu0 %v2163_v54  ;;  %1939 = vmatpush3.bf16.msra.mxu1 %v2164_v55 }
  0x97   : > { %1918 = vmatprep.subr.bf16.mxu0 %v2165_v56  ;;  %1940 = vmatprep.subr.bf16.mxu1 %v2166_v57 }
  0x9a   : > { %1919 = vmatpush3.bf16.msra.mxu0 %v2167_v58  ;;  %1941 = vmatpush3.bf16.msra.mxu1 %v2168_v59 }
  0x9b   : > { %1948 = vmatprep.subr.bf16.mxu0 %v2169_v60  ;;  %1970 = vmatprep.subr.bf16.mxu1 %v2170_v61  ;;  %v2171_v61 = vld [vmem:[#allocation7] sm:$0xff]  }
 0x150   : > { %v479_v11 = vpop.f32.mrb[0].mxu0  ;;  %v522_v12 = vpop.f32.mrb[0].mxu1 }
 0x151   : > { %v480_v13 = vadd.f32 %v479_v11, %v344_v5  ;;  %v523_v14 = vadd.f32 %v522_v12, %v352_v6  ;;  %v481_v15 = vpop.f32.mrb[1].mxu0  ;;  %v524_v16 = vpop.f32.mrb[1].mxu1 }
 0x152   : > { %v482_v18 = vadd.f32 %v481_v15, %v348_v8  ;;  %v525_v19 = vadd.f32 %v524_v16, %v356_v9  ;;  %v483_v20 = vpop.f32.mrb[2].mxu0  ;;  %v526_v21 = vpop.f32.mrb[2].mxu1  ;;  %v2175_v15 = vld [vmem:[#allocation7 + $0x8] sm:$0xff]  }
 0x153   : > { %v2647_v22 = vmax.f32 %v480_v13, 0.0  ;;  %v484_v23 = vadd.f32 %v483_v20, %v344_v5  ;;  %v527_v24 = vadd.f32 %v526_v21, %v352_v6  ;;  %v485_v25 = vpop.f32.mrb[3].mxu0  ;;  %v528_v26 = vpop.f32.mrb[3].mxu1  ;;  %v2649_v27 = vmax.f32 %v523_v14, 0.0  ;;  %v2177_v20 = vld [vmem:[#allocation7 + $0x50] sm:$0xff]  }
 0x154   : > { %v2651_v28 = vmax.f32 %v482_v18, 0.0  ;;  %v486_v29 = vadd.f32 %v485_v25, %v348_v8  ;;  %v529_v30 = vadd.f32 %v528_v26, %v356_v9  ;;  %v2657_v35 = vmax.f32 %v525_v19, 0.0  ;;  %v2178_v21 = vld [vmem:[#allocation7 + $0xd0] sm:$0xff]  }
 0x155   : > { %v578_v33 = vrot.slane %v2647_v22, 7  ;;  %v603_v34 = vrot.slane %v2647_v22, 1  ;;  %v2663_v37 = vmax.f32 %v484_v23, 0.0  ;;  %v2665_v38 = vmax.f32 %v527_v24, 0.0 }
 0x156   : > { %v536_v39 = vmax.f32 %v486_v29, 0.0  ;;  %v538_v40 = vmax.f32 %v529_v30, 0.0  ;;  %v580_v41 = vrot.slane %v2649_v27, 7  ;;  %v605_v42 = vrot.slane %v2649_v27, 1 }
 0x157   : > { %v579_v43 = vrot.slane %v2651_v28, 7  ;;  %v604_v44 = vrot.slane %v2651_v28, 1  ;;  %v582_v45 = vrot.slane %v2663_v37, 7  ;;  %v607_v46 = vrot.slane %v2663_v37, 1 }
 0x158   : > { %v696_v47 = vpack.c.bf16 %v2663_v37, %v2647_v22  ;;  %v584_v48 = vrot.slane %v2665_v38, 7  ;;  %v581_v49 = vrot.slane %v2657_v35, 7  ;;  %v609_v50 = vrot.slane %v2665_v38, 1 }
 0x159   : > { %v698_v51 = vpack.c.bf16 %v2665_v38, %v2649_v27  ;;  %v583_v52 = vrot.slane %v536_v39, 7  ;;  %v591_v53 = vsel %vm586_vm2, %v582_v45, %v578_v33  ;;  %v616_v54 = vsel %vm611_vm3, %v607_v46, %v603_v34  ;;  %v2182_v38 = vld [vmem:[#allocation7 + $0xd8] sm:$0xff]  }
 0x15a   : > { %v593_v55 = vsel %vm586_vm2, %v584_v48, %v580_v41  ;;  %v585_v56 = vrot.slane %v538_v40, 7  ;;  %v618_v57 = vsel %vm611_vm3, %v609_v50, %v605_v42  ;;  %v608_v58 = vrot.slane %v536_v39, 1 }
 0x15b   : > { %v697_v59 = vpack.c.bf16 %v536_v39, %v2651_v28  ;;  %v699_v60 = vpack.c.bf16 %v538_v40, %v2657_v35  ;;  %v588_v2 = vsel %vm586_vm2, %v579_v43, %v583_v52  ;;  %v592_v3 = vsel %vm586_vm2, %v583_v52, %v579_v43  ;;  %v2186_v43 = vld [vmem:[#allocation7 + $0xe0] sm:$0xff]   ;;  %v2195_v52 = vld [vmem:[#allocation7 + $0x30] sm:$0xff]  }
 0x15c   : > { %v590_v4 = vsel %vm586_vm2, %v581_v49, %v585_v56  ;;  %v594_v5 = vsel %vm586_vm2, %v585_v56, %v581_v49  ;;  %v610_v6 = vrot.slane %v538_v40, 1  ;;  %v596_v7 = vmul.f32 %v1799_v32, %v592_v3  ;;  %v2183_v40 = vld [vmem:[#allocation7 + $0x18] sm:$0xff]   ;;  %v2192_v49 = vld [vmem:[#allocation7 + $0xa8] sm:$0xff]   ;;  %v2209_v3 = vld [vmem:[#allocation7 + $0x250] sm:$0xff]  }
 0x15d   : > { %989 = vmatprep.mubr.bf16.mxu0 %v697_v59  ;;  %1030 = vmatprep.mubr.bf16.mxu1 %v699_v60  ;;  %v598_v8 = vmul.f32 %v1799_v32, %v594_v5  ;;  %v2704_v9 = vsel %vm586_vm2, %v578_v33, %v582_v45  ;;  %v2706_v10 = vmul.f32 %v1799_v32, %v591_v53  ;;  %v1800_v13 = vsel %vm2659_vm4, 1.0, %v2401_v31  ;;  %v2188_v45 = vld [vmem:[#allocation7 + $0xa0] sm:$0xff]   ;;  %v2196_v53 = vld [vmem:[#allocation7 + $0xb0] sm:$0xff]   ;;  %v2199_v56 = vld [vmem:[#allocation7 + $0x38] sm:$0xff]  }
 0x15e   : > { %990 = vmatmul.mubr.bf16.vlgmr.msra.gmra.mrb[4].mxu0 %v696_v47  ;;  %1031 = vmatmul.mubr.bf16.vlgmr.msra.gmra.mrb[4].mxu1 %v698_v51  ;;  %v2710_v11 = vsel %vm586_vm2, %v580_v41, %v584_v48  ;;  %v2712_v12 = vmul.f32 %v1799_v32, %v593_v55  ;;  %v606_v14 = vrot.slane %v2657_v35, 1  ;;  %v629_v16 = vpack.c.bf16 %v588_v2, %v596_v7  ;;  %v2179_v35 = vld [vmem:[#allocation7 + $0x10] sm:$0xff]   ;;  %v2184_v41 = vld [vmem:[#allocation7 + $0x98] sm:$0xff]   ;;  %v2190_v47 = vld [vmem:[#allocation7 + $0xe8] sm:$0xff]  }
 0x15f   : > { %1949 = vmatpush3.bf16.msra.mxu0 %v2171_v61  ;;  %1971 = vmatpush3.bf16.msra.mxu1 %v2172_v62  ;;  %v631_v18 = vpack.c.bf16 %v590_v4, %v598_v8  ;;  %v2719_v19 = vsel %vm611_vm3, %v604_v44, %v608_v58  ;;  %v628_v23 = vpack.c.bf16 %v2704_v9, %v2706_v10  ;;  %v2191_v48 = vld [vmem:[#allocation7 + $0x28] sm:$0xff]   ;;  %v2194_v51 = vld [vmem:[#allocation7 + $0xf0] sm:$0xff]   ;;  %v2198_v55 = vld [vmem:[#allocation7 + $0xf8] sm:$0xff]  }
 0x160   : > { %1950 = vmatprep.subr.bf16.mxu0 %v2173_v0  ;;  %1972 = vmatprep.subr.bf16.mxu1 %v2174_v1  ;;  %v630_v24 = vpack.c.bf16 %v2710_v11, %v2712_v12  ;;  %v617_v25 = vsel %vm611_vm3, %v608_v58, %v604_v44  ;;  %v2731_v28 = vsel %vm611_vm3, %v606_v14, %v610_v6  ;;  %v2187_v44 = vld [vmem:[#allocation7 + $0x20] sm:$0xff]   ;;  %v2205_v62 = vld [vmem:[#allocation7 + $0x248] sm:$0xff]   ;;  %v2210_v4 = vld [vmem:[#allocation7 + $0x2d0] sm:$0xff]  }
 0x161   : > { %1263 = vmatprep.mubr.bf16.mxu0 %v629_v16  ;;  %1304 = vmatprep.mubr.bf16.mxu1 %v631_v18  ;;  %v2727_v26 = vmul.f32 %v1800_v13, %v617_v25  ;;  %v619_v29 = vsel %vm611_vm3, %v610_v6, %v606_v14  ;;  %v2741_v31 = vsel %vm611_vm3, %v603_v34, %v607_v46  ;;  %v2181_v34 = vld [vmem:[#allocation7 + $0x58] sm:$0xff]   ;;  %v2189_v46 = vld [vmem:[#allocation7 + $0x68] sm:$0xff]   ;;  %v2201_v58 = vld [vmem:[#allocation7 + $0x240] sm:$0xff]  }
 0x162   : > { %v2735_v30 = vmul.f32 %v1800_v13, %v619_v29  ;;  %v2743_v32 = vmul.f32 %v1800_v13, %v616_v54  ;;  %v2749_v33 = vsel %vm611_vm3, %v605_v42, %v609_v50  ;;  %v2753_v22 = vmul.f32 %v1800_v13, %v618_v57  ;;  %v2185_v42 = vld [vmem:[#allocation7 + $0x60] sm:$0xff]   ;;  %v2193_v50 = vld [vmem:[#allocation7 + $0x70] sm:$0xff]   ;;  %v2197_v54 = vld [vmem:[#allocation7 + $0x78] sm:$0xff]  }
 0x163   : > { %1951 = vmatpush3.bf16.msra.mxu0 %v2175_v15  ;;  %1973 = vmatpush3.bf16.msra.mxu1 %v2176_v17  ;;  %v1314_v37 = vpack.c.bf16 %v2727_v26, %v2719_v19  ;;  %v2200_v57 = vld [vmem:[#allocation7 + $0xb8] sm:$0xff]   ;;  %v2202_v59 = vld [vmem:[#allocation7 + $0x2c0] sm:$0xff]   ;;  %v2206_v0 = vld [vmem:[#allocation7 + $0x2c8] sm:$0xff]  }
 0x164   : > { %1952 = vmatprep.subr.bf16.mxu0 %v2177_v20  ;;  %1974 = vmatprep.subr.bf16.mxu1 %v2178_v21  ;;  %v1316_v27 = vpack.c.bf16 %v2735_v30, %v2731_v28  ;;  %v1313_v63 = vpack.c.bf16 %v2743_v32, %v2741_v31  ;;  %v1315_v39 = vpack.c.bf16 %v2753_v22, %v2749_v33  ;;  %v2203_v60 = vld [vmem:[#allocation7 + $0x200] sm:$0xff]   ;;  %v2207_v1 = vld [vmem:[#allocation7 + $0x208] sm:$0xff]   ;;  %v2211_v5 = vld [vmem:[#allocation7 + $0x210] sm:$0xff]  }
 0x165   : > { %v2204_v61 = vld [vmem:[#allocation7 + $0x280] sm:$0xff]   ;;  %v2208_v2 = vld [vmem:[#allocation7 + $0x288] sm:$0xff]   ;;  %v2212_v6 = vld [vmem:[#allocation7 + $0x290] sm:$0xff]  }
 0x166   : > { %v2213_v7 = vld [vmem:[#allocation7 + $0x258] sm:$0xff]   ;;  %v2217_v11 = vld [vmem:[#allocation7 + $0x260] sm:$0xff]   ;;  %v2221_v15 = vld [vmem:[#allocation7 + $0x268] sm:$0xff]  }
 0x167   : > { %1953 = vmatpush3.bf16.msra.mxu0 %v2179_v35  ;;  %1975 = vmatpush3.bf16.msra.mxu1 %v2180_v36  ;;  %v2214_v8 = vld [vmem:[#allocation7 + $0x2d8] sm:$0xff]   ;;  %v2218_v12 = vld [vmem:[#allocation7 + $0x2e0] sm:$0xff]   ;;  %v2222_v16 = vld [vmem:[#allocation7 + $0x2e8] sm:$0xff]  }
 0x168   : > { %1954 = vmatprep.subr.bf16.mxu0 %v2181_v34  ;;  %1976 = vmatprep.subr.bf16.mxu1 %v2182_v38  ;;  %v2215_v9 = vld [vmem:[#allocation7 + $0x218] sm:$0xff]   ;;  %v2219_v13 = vld [vmem:[#allocation7 + $0x220] sm:$0xff]   ;;  %v2223_v17 = vld [vmem:[#allocation7 + $0x228] sm:$0xff]  }
 0x169   : > { %v2216_v10 = vld [vmem:[#allocation7 + $0x298] sm:$0xff]   ;;  %v2220_v14 = vld [vmem:[#allocation7 + $0x2a0] sm:$0xff]   ;;  %v2224_v18 = vld [vmem:[#allocation7 + $0x2a8] sm:$0xff]  }
 0x16a   : > { %v2225_v19 = vld [vmem:[#allocation7 + $0x270] sm:$0xff]   ;;  %v2230_v25 = vld [vmem:[#allocation7 + $0x2f8] sm:$0xff]  }
 0x16b   : > { %1955 = vmatpush3.bf16.msra.mxu0 %v2183_v40  ;;  %1977 = vmatpush3.bf16.msra.mxu1 %v2184_v41  ;;  %v2226_v20 = vld [vmem:[#allocation7 + $0x2f0] sm:$0xff]   ;;  %v2231_v26 = vld [vmem:[#allocation7 + $0x238] sm:$0xff]  }
 0x16c   : > { %1956 = vmatprep.subr.bf16.mxu0 %v2185_v42  ;;  %1978 = vmatprep.subr.bf16.mxu1 %v2186_v43  ;;  %v2227_v21 = vld [vmem:[#allocation7 + $0x230] sm:$0xff]   ;;  %v2232_v28 = vld [vmem:[#allocation7 + $0x2b8] sm:$0xff]  }
 0x16f   : > { %1957 = vmatpush3.bf16.msra.mxu0 %v2187_v44  ;;  %1979 = vmatpush3.bf16.msra.mxu1 %v2188_v45 }
 0x170   : > { %1958 = vmatprep.subr.bf16.mxu0 %v2189_v46  ;;  %1980 = vmatprep.subr.bf16.mxu1 %v2190_v47 }
 0x173   : > { %1959 = vmatpush3.bf16.msra.mxu0 %v2191_v48  ;;  %1981 = vmatpush3.bf16.msra.mxu1 %v2192_v49 }
 0x174   : > { %1960 = vmatprep.subr.bf16.mxu0 %v2193_v50  ;;  %1982 = vmatprep.subr.bf16.mxu1 %v2194_v51 }
 0x177   : > { %1961 = vmatpush3.bf16.msra.mxu0 %v2195_v52  ;;  %1983 = vmatpush3.bf16.msra.mxu1 %v2196_v53 }
 0x178   : > { %1962 = vmatprep.subr.bf16.mxu0 %v2197_v54  ;;  %1984 = vmatprep.subr.bf16.mxu1 %v2198_v55 }
 0x17b   : > { %1963 = vmatpush3.bf16.msra.mxu0 %v2199_v56  ;;  %1985 = vmatpush3.bf16.msra.mxu1 %v2200_v57 }
 0x17c   : > { %1992 = vmatprep.subr.bf16.mxu0 %v2201_v58  ;;  %2014 = vmatprep.subr.bf16.mxu1 %v2202_v59 }
 0x17e   : > { %1264 = vmatmul.mubr.bf16.vlgmr.msra.gmra.mrb[8].mxu0 %v628_v23  ;;  %1305 = vmatmul.mubr.bf16.vlgmr.msra.gmra.mrb[8].mxu1 %v630_v24  ;;  %v2228_v23 = vld [vmem:[#allocation7 + $0x2b0] sm:$0xff]   ;;  %v2229_v24 = vld [vmem:[#allocation7 + $0x278] sm:$0xff]  }
 0x17f   : > { %1993 = vmatpush3.bf16.msra.mxu0 %v2203_v60  ;;  %1606 = vmatprep.mubr.bf16.mxu0 %v1314_v37 }
 0x180   : > { %2015 = vmatpush3.bf16.msra.mxu1 %v2204_v61  ;;  %1647 = vmatprep.mubr.bf16.mxu1 %v1316_v27 }
 0x181   : > { %1994 = vmatprep.subr.bf16.mxu0 %v2205_v62  ;;  %2016 = vmatprep.subr.bf16.mxu1 %v2206_v0 }
 0x183   : > { %1995 = vmatpush3.bf16.msra.mxu0 %v2207_v1 }
 0x184   : > { %2017 = vmatpush3.bf16.msra.mxu1 %v2208_v2  ;;  %1996 = vmatprep.subr.bf16.mxu0 %v2209_v3 }
 0x185   : > { %2018 = vmatprep.subr.bf16.mxu1 %v2210_v4 }
 0x187   : > { %1997 = vmatpush3.bf16.msra.mxu0 %v2211_v5 }
 0x188   : > { %2019 = vmatpush3.bf16.msra.mxu1 %v2212_v6  ;;  %1998 = vmatprep.subr.bf16.mxu0 %v2213_v7 }
 0x189   : > { %2020 = vmatprep.subr.bf16.mxu1 %v2214_v8 }
 0x18b   : > { %1999 = vmatpush3.bf16.msra.mxu0 %v2215_v9 }
 0x18c   : > { %2021 = vmatpush3.bf16.msra.mxu1 %v2216_v10  ;;  %2000 = vmatprep.subr.bf16.mxu0 %v2217_v11 }
 0x18d   : > { %2022 = vmatprep.subr.bf16.mxu1 %v2218_v12 }
 0x18f   : > { %2001 = vmatpush3.bf16.msra.mxu0 %v2219_v13 }
 0x190   : > { %2023 = vmatpush3.bf16.msra.mxu1 %v2220_v14  ;;  %2002 = vmatprep.subr.bf16.mxu0 %v2221_v15 }
 0x191   : > { %2024 = vmatprep.subr.bf16.mxu1 %v2222_v16 }
 0x193   : > { %2003 = vmatpush3.bf16.msra.mxu0 %v2223_v17 }
 0x194   : > { %2025 = vmatpush3.bf16.msra.mxu1 %v2224_v18  ;;  %2004 = vmatprep.subr.bf16.mxu0 %v2225_v19 }
 0x195   : > { %2026 = vmatprep.subr.bf16.mxu1 %v2226_v20 }
 0x197   : > { %2005 = vmatpush3.bf16.msra.mxu0 %v2227_v21 }
 0x198   : > { %2027 = vmatpush3.bf16.msra.mxu1 %v2228_v23  ;;  %2006 = vmatprep.subr.bf16.mxu0 %v2229_v24 }
 0x199   : > { %2028 = vmatprep.subr.bf16.mxu1 %v2230_v25 }
 0x19b   : > { %2007 = vmatpush3.bf16.msra.mxu0 %v2231_v26 }
 0x19c   : > { %2029 = vmatpush3.bf16.msra.mxu1 %v2232_v28 }
 0x19e   : > { %1607 = vmatmul.mubr.bf16.vlgmr.msra.gmra.mrb[12].mxu0 %v1313_v63 }
 0x19f   : > { %1648 = vmatmul.mubr.bf16.vlgmr.msra.gmra.mrb[12].mxu1 %v1315_v39 }
 0x231   : > { %v1920_v29 = vpop.f32.mrb[4].mxu0  ;;  %v1942_v30 = vpop.f32.mrb[4].mxu1 }
 0x232   : > { %v1921_v35 = vpop.f32.mrb[5].mxu0  ;;  %v1943_v36 = vpop.f32.mrb[5].mxu1 }
 0x233   : > { %v1922_v37 = vadd.f32 %v1921_v35, %v1920_v29  ;;  %v1944_v34 = vadd.f32 %v1943_v36, %v1942_v30  ;;  %v1923_v38 = vpop.f32.mrb[6].mxu0  ;;  %v1945_v27 = vpop.f32.mrb[6].mxu1 }
 0x234   : > { %v1924_v40 = vpop.f32.mrb[7].mxu0  ;;  %v1946_v41 = vpop.f32.mrb[7].mxu1 }
 0x235   : > { %v1033_v42 = vadd.f32 %v1944_v34, %v1922_v37  ;;  %v1925_v43 = vadd.f32 %v1924_v40, %v1923_v38  ;;  %v1947_v44 = vadd.f32 %v1946_v41, %v1945_v27 }
 0x237   : > { %v1036_v45 = vadd.f32 %v1947_v44, %v1925_v43 }
 0x251   : > { %v1964_v31 = vpop.f32.mrb[8].mxu0  ;;  %v1986_v32 = vpop.f32.mrb[8].mxu1 }
 0x252   : > { %v1965_v63 = vpop.f32.mrb[9].mxu0  ;;  %v1987_v46 = vpop.f32.mrb[9].mxu1 }
 0x253   : > { %v1966_v33 = vadd.f32 %v1965_v63, %v1964_v31  ;;  %v1988_v22 = vadd.f32 %v1987_v46, %v1986_v32  ;;  %v1967_v39 = vpop.f32.mrb[10].mxu0  ;;  %v1989_v47 = vpop.f32.mrb[10].mxu1 }
 0x254   : > { %v1968_v48 = vpop.f32.mrb[11].mxu0  ;;  %v1990_v49 = vpop.f32.mrb[11].mxu1 }
 0x255   : > { %v1266_v50 = vadd.f32 %v1966_v33, %v1033_v42  ;;  %v1969_v51 = vadd.f32 %v1968_v48, %v1967_v39  ;;  %v1991_v52 = vadd.f32 %v1990_v49, %v1989_v47 }
 0x257   : > { %v1307_v53 = vadd.f32 %v1988_v22, %v1266_v50  ;;  %v1269_v54 = vadd.f32 %v1969_v51, %v1036_v45 }
 0x259   : > { %v1310_v55 = vadd.f32 %v1991_v52, %v1269_v54 }
 0x271   : > { %v2008_v56 = vpop.f32.mrb[12].mxu0 }
 0x272   : > { %v2030_v57 = vpop.f32.mrb[12].mxu1  ;;  %v2009_v58 = vpop.f32.mrb[13].mxu0 }
 0x273   : > { %v2010_v59 = vadd.f32 %v2009_v58, %v2008_v56  ;;  %v2031_v60 = vpop.f32.mrb[13].mxu1  ;;  %v2011_v61 = vpop.f32.mrb[14].mxu0 }
 0x274   : > { %v2032_v62 = vadd.f32 %v2031_v60, %v2030_v57  ;;  %v2033_v0 = vpop.f32.mrb[14].mxu1  ;;  %v2012_v1 = vpop.f32.mrb[15].mxu0 }
 0x275   : > { %v2013_v2 = vadd.f32 %v2012_v1, %v2011_v61  ;;  %v2034_v3 = vpop.f32.mrb[15].mxu1 }
 0x276   : > { %v1650_v4 = vadd.f32 %v2032_v62, %v2010_v59  ;;  %v2035_v5 = vadd.f32 %v2034_v3, %v2033_v0 }
 0x278   : > { %v1656_v6 = vadd.f32 %v1650_v4, %v1307_v53  ;;  %v1653_v7 = vadd.f32 %v2035_v5, %v2013_v2 }
 0x27a   : > { %1658 = vst [vmem:[%s298_s15] sm:$0xff] %v1656_v6  ;;  %v1657_v8 = vadd.f32 %v1653_v7, %v1310_v55 }
 0x27c   : > { %1659 = vst [vmem:[%s298_s15 + $0x8] sm:$0xff] %v1657_v8 }
 0x27d   : > { %2332 = shalt.err (!%p2329_p2)
}
 0x27e   : > { %s2333_s16 = scalar_lea.hbm %s2781_s14, 256  ;;  %s2337_s19 = scalar_lea.hbm %s2831_s6, 512 }
 0x27f   : > { %p2334_p13 = scmp.ne.s32.totalorder %s2781_s14, %s2333_s16  ;;  %p2338_p4 = scmp.lt.u32.totalorder %s2781_s14, %s2831_s6 }
 0x280   : > { %p2339_p7 = scmp.lt.u32.totalorder %s2337_s19, %s2333_s16  ;;  %p2341_p11 = scmp.lt.u32.totalorder %s2333_s16, %s2781_s14 }
 0x281   : > { %p2335_p6 = pnand %p2334_p13, %p2847_p0 }
 0x282   : > { %p2340_p8 = por %p2339_p7, %p2338_p4 }
 0x283   : > { %p2336_p10 = pneg %p2335_p6 }
 0x284   : > { %p2342_p1 = por %p2341_p11, %p2340_p8 }
 0x286   : > { %p2343_p3 = pnand %p2342_p1, %p2336_p10 }
 0x288   : > { %2346 = shalt.err (!%p2343_p3)
}
 0x289   : > { %s2403_s20 = smov 128   ;;  %s2404_s9 = smov 8  }
 0x28a   : > { %2046 = dma.vmem_to_hbm [thread:$0]  (%p2847_p0), %s2776_s7, 256, %s2781_s14, %s1661_s10, %s2403_s20, %s2403_s20, %s2404_s9  }
 0x28b PF: > { %s1689_s8 = sand.u32 1, %s2377_s21   ;;  %p2848_p5 = scmp.ne.s32.totalorder %s2836_s28, 0 }
 0x28c   : > { %p2849_p9 = scmp.ge.s32.totalorder %s2389_s24, 2  ;;  %s1690_s25 = scalar_lea.sflag [#allocation4], %s1689_s8 }
 0x28e   : > { %p2060_p12 = pnand %p2849_p9, %p2848_p5 }
 0x290   : > { %2372 = dma.done.wait (!%p2060_p12), %s1690_s25, 256  }
 0x291   : > { %2374 = vsyncadd (!%p2060_p12), %s1690_s25, 4294967040  ;;  %p20_p2 = scmp.ge.s32.totalorder %s2550_s26, 4   ;;  %s2850_s21 = smov %s2381_s22 }
 0x292   : > { %s2851_s22 = smov %s2385_s23  ;;  %s2852_s23 = smov %s2559_s11 }
 0x293   : > { %s2853_s24 = smov %s2550_s26  ;;  %22 = sbr.rel (!%p20_p2) target bundleno = 6 (0x6), region = 99 }
 0x29a   :  { %1695 = vsyncpa [#allocation3], 1 }
 0x29b   :  { %1697 = vsyncpa [#allocation3 + $0x1], 1 }
 0x29c   :  { %1698 = vsyncpa [#allocation6], 1 }
 0x29d   :  { %1699 = vsyncpa [#allocation4], 1 }
 0x29e   :  { %1701 = vsyncpa [#allocation4 + $0x1], 1 }

</bundles_post_ra>
